<compile_context>
chip_gen: v5e
topology: v5e:2x2
jax: 0.10.0
libtpu: 0.0.40
codegen_flags: <defaults>
</compile_context>

<pallas_src>
import functools
import math

import jax
import jax.numpy as jnp
from jax.experimental import pallas as pl
from jax.experimental.pallas import tpu as pltpu


LANE = 128      # pad every feature/hidden/output dim to the 128-lane vreg width
SUBLANE = 8     # f32 sublane tile -> batch tile size


def _round_up(x, m):
    return ((x + m - 1) // m) * m


# ----------------------------- Pallas kernel ------------------------------

def _fused_mlp_kernel(x_ref, wf_ref, bf_ref, wh_ref, bh_ref, out_ref, rep_ref,
                      *, n_feat: int):
    """Fused forward pass over one (tb, P) batch tile.

    x_ref  : (tb, P)        f32   padded input
    wf_ref : (n_feat, P, P) bf16  stacked featurizer weights, (in, out) layout
    bf_ref : (n_feat, 1, P) f32   stacked featurizer biases
    wh_ref : (2, P, P)      bf16  stacked head weights, (in, out) layout
    bh_ref : (2, 1, P)      f32   stacked head biases
    out_ref: (tb, P)        f32   head output      (valid cols [:output_size])
    rep_ref: (tb, P)        f32   representation   (valid cols [:input_size])
    """
    h = x_ref[...]                                        # f32 (tb, P)

    # Featurizer: [Linear + ReLU] * n_feat.  Static unroll is fine for small n_feat.
    # TODO(synk): switch to lax.fori_loop over the stacked refs if hidden_layers grows large.
    for i in range(n_feat):
        y = jnp.dot(h.astype(jnp.bfloat16), wf_ref[i],
                    preferred_element_type=jnp.float32)   # bf16 MXU, f32 accumulate
        h = jnp.maximum(y + bf_ref[i], 0.0)                # bias + ReLU in f32

    rep_ref[...] = h                                       # lane-dense (tb, 128) store

    # Head: Linear -> ReLU -> Linear.
    y = jnp.dot(h.astype(jnp.bfloat16), wh_ref[0], preferred_element_type=jnp.float32)
    h = jnp.maximum(y + bh_ref[0], 0.0)
    y = jnp.dot(h.astype(jnp.bfloat16), wh_ref[1], preferred_element_type=jnp.float32)
    out_ref[...] = y + bh_ref[1]                           # lane-dense (tb, 128) store


# ------------------------------ MLP wrapper -------------------------------

def init_mlp_params(key, input_size, hidden_nodes, hidden_layers, task):
    """Xavier-uniform weights (gain=1, bias=0), stored stacked, padded to 128 lanes,
    pre-transposed to (in_features, out_features), bf16."""
    assert hidden_layers >= 1
    if task == "all":
        output_size = 2
    elif task == "sum":
        output_size = 3
    else:
        output_size = 1
    n_feat = hidden_layers
    P = max(_round_up(input_size, LANE),
            _round_up(hidden_nodes, LANE),
            _round_up(output_size, LANE))
    keys = jax.random.split(key, n_feat + 2)

    def xavier_T(k, in_f, out_f):
        limit = math.sqrt(6.0 / (in_f + out_f))
        return jax.random.uniform(k, (in_f, out_f), jnp.float32,
                                  minval=-limit, maxval=limit)

    def pad(w):
        return jnp.zeros((P, P), jnp.float32).at[:w.shape[0], :w.shape[1]].set(w)

    wf = jnp.stack([pad(xavier_T(keys[i], input_size, input_size))
                    for i in range(n_feat)]).astype(jnp.bfloat16)
    bf = jnp.zeros((n_feat, 1, P), jnp.float32)
    wh = jnp.stack([pad(xavier_T(keys[n_feat], input_size, hidden_nodes)),
                    pad(xavier_T(keys[n_feat + 1], hidden_nodes, output_size))]
                   ).astype(jnp.bfloat16)
    bh = jnp.zeros((2, 1, P), jnp.float32)

    return {"wf": wf, "bf": bf, "wh": wh, "bh": bh, "P": P, "n_feat": n_feat,
            "input_size": input_size, "hidden_nodes": hidden_nodes,
            "output_size": output_size}


def mlp_forward(params, x, *, tb=SUBLANE):
    """Single fused pallas_call: returns (head_output (B, out), representation (B, in))."""
    P = params["P"]
    n_feat = params["n_feat"]
    B, in_f = x.shape
    Bp = _round_up(B, tb)
    xp = jnp.zeros((Bp, P), jnp.float32).at[:B, :in_f].set(x.astype(jnp.float32))

    kernel = functools.partial(_fused_mlp_kernel, n_feat=n_feat)
    out_p, rep_p = pl.pallas_call(
        kernel,
        grid=(Bp // tb,),
        in_specs=[
            pl.BlockSpec((tb, P), lambda i: (i, 0)),            # x: batch-tiled
            pl.BlockSpec((n_feat, P, P), lambda i: (0, 0, 0)),  # weights: VMEM-resident
            pl.BlockSpec((n_feat, 1, P), lambda i: (0, 0, 0)),
            pl.BlockSpec((2, P, P), lambda i: (0, 0, 0)),
            pl.BlockSpec((2, 1, P), lambda i: (0, 0, 0)),
        ],
        out_specs=(
            pl.BlockSpec((tb, P), lambda i: (i, 0)),
            pl.BlockSpec((tb, P), lambda i: (i, 0)),
        ),
        out_shape=(
            jax.ShapeDtypeStruct((Bp, P), jnp.float32),   # head output (padded, lane-dense)
            jax.ShapeDtypeStruct((Bp, P), jnp.float32),   # representation (padded, lane-dense)
        ),
        compiler_params=pltpu.CompilerParams(
            dimension_semantics=("parallel",)),            # 2x on v7x once batch > 1 tile
    )(xp, params["wf"], params["bf"], params["wh"], params["bh"])

    out = out_p[:B, :params["output_size"]]
    rep = rep_p[:B, :params["input_size"]]
    return out, rep


# ------------------------------ references --------------------------------

def mlp_forward_ref(params, x, *, bf16_matmul):
    """Pure-JAX reference on the UNPADDED weight slices.

    bf16_matmul=True  -> exact same math as the kernel (bf16 operands, f32 accumulate).
    bf16_matmul=False -> full-f32 matmuls = original PyTorch module semantics.
    """
    in_f = params["input_size"]
    hid = params["hidden_nodes"]
    out_f = params["output_size"]

    def dot(a, w_bf16):
        if bf16_matmul:
            return jnp.dot(a.astype(jnp.bfloat16), w_bf16,
                           preferred_element_type=jnp.float32)
        return jnp.dot(a, w_bf16.astype(jnp.float32),
                       preferred_element_type=jnp.float32,
                       precision=jax.lax.Precision.HIGHEST)

    h = x.astype(jnp.float32)
    for i in range(params["n_feat"]):
        w = params["wf"][i, :in_f, :in_f]
        b = params["bf"][i, 0, :in_f]
        h = jnp.maximum(dot(h, w) + b, 0.0)
    rep = h
    w1 = params["wh"][0, :in_f, :hid]
    b1 = params["bh"][0, 0, :hid]
    w2 = params["wh"][1, :hid, :out_f]
    b2 = params["bh"][1, 0, :out_f]
    h = jnp.maximum(dot(rep, w1) + b1, 0.0)
    return dot(h, w2) + b2, rep


# --------------------------------- main -----------------------------------

if __name__ == "__main__":
    input_size = 32
    hidden_nodes = 32
    hidden_layers = 2
    task = "sum"          # -> output_size = 3
    batch = 8

    key = jax.random.PRNGKey(0)
    k_params, k_x = jax.random.split(key)
    params = init_mlp_params(k_params, input_size, hidden_nodes, hidden_layers, task)
    x = jax.random.normal(k_x, (batch, input_size), jnp.float32)

    out, rep = mlp_forward(params, x)
    out = jax.block_until_ready(out)
    rep = jax.block_until_ready(rep)

    assert out.shape == (batch, 3), out.shape
    assert rep.shape == (batch, input_size), rep.shape

    # Tight check: reference performing the identical bf16-operand / f32-accumulate math.
    ref_out, ref_rep = mlp_forward_ref(params, x, bf16_matmul=True)
    assert jnp.allclose(out, ref_out, atol=1e-5, rtol=1e-5), "output mismatch vs bf16 reference"
    assert jnp.allclose(rep, ref_rep, atol=1e-5, rtol=1e-5), "representation mismatch vs bf16 reference"

    # Loose sanity check vs full-f32 spec semantics (bf16 MXU operands ~1e-2 error).
    ref_out_f32, ref_rep_f32 = mlp_forward_ref(params, x, bf16_matmul=False)
    assert jnp.allclose(out, ref_out_f32, atol=1e-1, rtol=5e-2), "output drifted from f32 spec"
    assert jnp.allclose(rep, ref_rep_f32, atol=1e-1, rtol=5e-2), "representation drifted from f32 spec"

    print("KERNEL_OK")
</pallas_src>

<mosaic_0001>
module attributes {stable_mosaic.version = 11 : i64} {
  func.func @_fused_mlp_kernel(%arg0: i32, %arg1: memref<8x128xf32, #tpu.memory_space<vmem>>, %arg2: memref<2x128x128xbf16, #tpu.memory_space<vmem>>, %arg3: memref<2x1x128xf32, #tpu.memory_space<vmem>>, %arg4: memref<2x128x128xbf16, #tpu.memory_space<vmem>>, %arg5: memref<2x1x128xf32, #tpu.memory_space<vmem>>, %arg6: memref<8x128xf32, #tpu.memory_space<vmem>>, %arg7: memref<8x128xf32, #tpu.memory_space<vmem>>) attributes {dimension_semantics = [#tpu.dimension_semantics<parallel>], iteration_bounds = array<i64: 1>, scalar_prefetch = 0 : i64, scratch_operands = 0 : i64, tpu.core_type = #tpu.core_type<tc>, window_params = [{transform_indices = @transform_0, window_bounds = array<i64: 8, 128>}, {pipeline_mode = #tpu.pipeline_mode<synchronous>, transform_indices = @transform_1, window_bounds = array<i64: 2, 128, 128>}, {pipeline_mode = #tpu.pipeline_mode<synchronous>, transform_indices = @transform_2, window_bounds = array<i64: 2, 1, 128>}, {pipeline_mode = #tpu.pipeline_mode<synchronous>, transform_indices = @transform_3, window_bounds = array<i64: 2, 128, 128>}, {pipeline_mode = #tpu.pipeline_mode<synchronous>, transform_indices = @transform_4, window_bounds = array<i64: 2, 1, 128>}, {transform_indices = @transform_5, window_bounds = array<i64: 8, 128>}, {transform_indices = @transform_6, window_bounds = array<i64: 8, 128>}]} {
    %c0 = arith.constant 0 : index
    %c0_0 = arith.constant 0 : index
    %0 = vector.load %arg1[%c0, %c0_0] : memref<8x128xf32, #tpu.memory_space<vmem>>, vector<8x128xf32>
    %1 = arith.truncf %0 : vector<8x128xf32> to vector<8x128xbf16>
    %c0_1 = arith.constant 0 : index
    %c0_2 = arith.constant 0 : index
    %c0_3 = arith.constant 0 : index
    %2 = vector.load %arg2[%c0_1, %c0_2, %c0_3] : memref<2x128x128xbf16, #tpu.memory_space<vmem>>, vector<1x128x128xbf16>
    %3 = vector.shape_cast %2 : vector<1x128x128xbf16> to vector<128x128xbf16>
    %cst = arith.constant dense<0.000000e+00> : vector<8x128xf32>
    %4 = tpu.matmul %1, %3, %cst {dimension_numbers = #tpu.dot_dimension_numbers<[1], [0], [0], [1], [0, 0, 1, 1], [], []>} : vector<8x128xbf16>, vector<128x128xbf16>, vector<8x128xf32> -> vector<8x128xf32>
    %c0_4 = arith.constant 0 : index
    %c0_5 = arith.constant 0 : index
    %c0_6 = arith.constant 0 : index
    %5 = vector.load %arg3[%c0_4, %c0_5, %c0_6] : memref<2x1x128xf32, #tpu.memory_space<vmem>>, vector<1x1x128xf32>
    %6 = vector.shape_cast %5 : vector<1x1x128xf32> to vector<1x128xf32>
    %7 = vector.broadcast %6 : vector<1x128xf32> to vector<8x128xf32>
    %8 = arith.addf %4, %7 : vector<8x128xf32>
    %cst_7 = arith.constant 0.000000e+00 : f32
    %9 = vector.broadcast %cst_7 : f32 to vector<8x128xf32>
    %10 = arith.maximumf %8, %9 : vector<8x128xf32>
    %11 = arith.truncf %10 : vector<8x128xf32> to vector<8x128xbf16>
    %c1 = arith.constant 1 : index
    %c0_8 = arith.constant 0 : index
    %c0_9 = arith.constant 0 : index
    %12 = vector.load %arg2[%c1, %c0_8, %c0_9] : memref<2x128x128xbf16, #tpu.memory_space<vmem>>, vector<1x128x128xbf16>
    %13 = vector.shape_cast %12 : vector<1x128x128xbf16> to vector<128x128xbf16>
    %cst_10 = arith.constant dense<0.000000e+00> : vector<8x128xf32>
    %14 = tpu.matmul %11, %13, %cst_10 {dimension_numbers = #tpu.dot_dimension_numbers<[1], [0], [0], [1], [0, 0, 1, 1], [], []>} : vector<8x128xbf16>, vector<128x128xbf16>, vector<8x128xf32> -> vector<8x128xf32>
    %c1_11 = arith.constant 1 : index
    %c0_12 = arith.constant 0 : index
    %c0_13 = arith.constant 0 : index
    %15 = vector.load %arg3[%c1_11, %c0_12, %c0_13] : memref<2x1x128xf32, #tpu.memory_space<vmem>>, vector<1x1x128xf32>
    %16 = vector.shape_cast %15 : vector<1x1x128xf32> to vector<1x128xf32>
    %17 = vector.broadcast %16 : vector<1x128xf32> to vector<8x128xf32>
    %18 = arith.addf %14, %17 : vector<8x128xf32>
    %cst_14 = arith.constant 0.000000e+00 : f32
    %19 = vector.broadcast %cst_14 : f32 to vector<8x128xf32>
    %20 = arith.maximumf %18, %19 : vector<8x128xf32>
    %c0_15 = arith.constant 0 : index
    %c0_16 = arith.constant 0 : index
    %21 = vector.load %arg7[%c0_15, %c0_16] : memref<8x128xf32, #tpu.memory_space<vmem>>, vector<8x128xf32>
    tpu.vector_store %arg7[%c0_15, %c0_16], %20 {strides = array<i32>} : memref<8x128xf32, #tpu.memory_space<vmem>>, vector<8x128xf32>,
    %22 = arith.truncf %20 : vector<8x128xf32> to vector<8x128xbf16>
    %c0_17 = arith.constant 0 : index
    %c0_18 = arith.constant 0 : index
    %c0_19 = arith.constant 0 : index
    %23 = vector.load %arg4[%c0_17, %c0_18, %c0_19] : memref<2x128x128xbf16, #tpu.memory_space<vmem>>, vector<1x128x128xbf16>
    %24 = vector.shape_cast %23 : vector<1x128x128xbf16> to vector<128x128xbf16>
    %cst_20 = arith.constant dense<0.000000e+00> : vector<8x128xf32>
    %25 = tpu.matmul %22, %24, %cst_20 {dimension_numbers = #tpu.dot_dimension_numbers<[1], [0], [0], [1], [0, 0, 1, 1], [], []>} : vector<8x128xbf16>, vector<128x128xbf16>, vector<8x128xf32> -> vector<8x128xf32>
    %c0_21 = arith.constant 0 : index
    %c0_22 = arith.constant 0 : index
    %c0_23 = arith.constant 0 : index
    %26 = vector.load %arg5[%c0_21, %c0_22, %c0_23] : memref<2x1x128xf32, #tpu.memory_space<vmem>>, vector<1x1x128xf32>
    %27 = vector.shape_cast %26 : vector<1x1x128xf32> to vector<1x128xf32>
    %28 = vector.broadcast %27 : vector<1x128xf32> to vector<8x128xf32>
    %29 = arith.addf %25, %28 : vector<8x128xf32>
    %cst_24 = arith.constant 0.000000e+00 : f32
    %30 = vector.broadcast %cst_24 : f32 to vector<8x128xf32>
    %31 = arith.maximumf %29, %30 : vector<8x128xf32>
    %32 = arith.truncf %31 : vector<8x128xf32> to vector<8x128xbf16>
    %c1_25 = arith.constant 1 : index
    %c0_26 = arith.constant 0 : index
    %c0_27 = arith.constant 0 : index
    %33 = vector.load %arg4[%c1_25, %c0_26, %c0_27] : memref<2x128x128xbf16, #tpu.memory_space<vmem>>, vector<1x128x128xbf16>
    %34 = vector.shape_cast %33 : vector<1x128x128xbf16> to vector<128x128xbf16>
    %cst_28 = arith.constant dense<0.000000e+00> : vector<8x128xf32>
    %35 = tpu.matmul %32, %34, %cst_28 {dimension_numbers = #tpu.dot_dimension_numbers<[1], [0], [0], [1], [0, 0, 1, 1], [], []>} : vector<8x128xbf16>, vector<128x128xbf16>, vector<8x128xf32> -> vector<8x128xf32>
    %c1_29 = arith.constant 1 : index
    %c0_30 = arith.constant 0 : index
    %c0_31 = arith.constant 0 : index
    %36 = vector.load %arg5[%c1_29, %c0_30, %c0_31] : memref<2x1x128xf32, #tpu.memory_space<vmem>>, vector<1x1x128xf32>
    %37 = vector.shape_cast %36 : vector<1x1x128xf32> to vector<1x128xf32>
    %38 = vector.broadcast %37 : vector<1x128xf32> to vector<8x128xf32>
    %39 = arith.addf %35, %38 : vector<8x128xf32>
    %c0_32 = arith.constant 0 : index
    %c0_33 = arith.constant 0 : index
    %40 = vector.load %arg6[%c0_32, %c0_33] : memref<8x128xf32, #tpu.memory_space<vmem>>, vector<8x128xf32>
    tpu.vector_store %arg6[%c0_32, %c0_33], %39 {strides = array<i32>} : memref<8x128xf32, #tpu.memory_space<vmem>>, vector<8x128xf32>,
    return
  }
  func.func @transform_0(%arg0: i32) -> (i32, i32) {
    %c0_i32 = arith.constant 0 : i32
    %c0_i32_0 = arith.constant 0 : i32
    return %arg0, %c0_i32 : i32, i32
  }
  func.func @transform_1(%arg0: i32) -> (i32, i32, i32) {
    %c0_i32 = arith.constant 0 : i32
    %c0_i32_0 = arith.constant 0 : i32
    %c0_i32_1 = arith.constant 0 : i32
    %c0_i32_2 = arith.constant 0 : i32
    return %c0_i32, %c0_i32_0, %c0_i32_1 : i32, i32, i32
  }
  func.func @transform_2(%arg0: i32) -> (i32, i32, i32) {
    %c0_i32 = arith.constant 0 : i32
    %c0_i32_0 = arith.constant 0 : i32
    %c0_i32_1 = arith.constant 0 : i32
    %c0_i32_2 = arith.constant 0 : i32
    return %c0_i32, %c0_i32_0, %c0_i32_1 : i32, i32, i32
  }
  func.func @transform_3(%arg0: i32) -> (i32, i32, i32) {
    %c0_i32 = arith.constant 0 : i32
    %c0_i32_0 = arith.constant 0 : i32
    %c0_i32_1 = arith.constant 0 : i32
    %c0_i32_2 = arith.constant 0 : i32
    return %c0_i32, %c0_i32_0, %c0_i32_1 : i32, i32, i32
  }
  func.func @transform_4(%arg0: i32) -> (i32, i32, i32) {
    %c0_i32 = arith.constant 0 : i32
    %c0_i32_0 = arith.constant 0 : i32
    %c0_i32_1 = arith.constant 0 : i32
    %c0_i32_2 = arith.constant 0 : i32
    return %c0_i32, %c0_i32_0, %c0_i32_1 : i32, i32, i32
  }
  func.func @transform_5(%arg0: i32) -> (i32, i32) {
    %c0_i32 = arith.constant 0 : i32
    %c0_i32_0 = arith.constant 0 : i32
    return %arg0, %c0_i32 : i32, i32
  }
  func.func @transform_6(%arg0: i32) -> (i32, i32) {
    %c0_i32 = arith.constant 0 : i32
    %c0_i32_0 = arith.constant 0 : i32
    return %arg0, %c0_i32 : i32, i32
  }
}

</mosaic_0001>

<bundles_post_ra>
// kernel: tpu_custom_call.1
= control target key start
LH: loop header
LB: loop body
LE: loop exit
PB: predicated region body
PF: predicated region fallthrough
CT: control target
= control target key end

     0   :  { %12 = vsyncpa [#allocation3], 0  ;;  %s856_s0 = inlined_call_operand.hbm [shape: f32[8,128], index: 0, kind: input, shape index: {}]   ;;  %s857_s1 = inlined_call_operand.hbm [shape: bf16[2,128,128], index: 1, kind: input, shape index: {}]   ;;  %s858_s2 = inlined_call_operand.hbm [shape: f32[2,1,128], index: 2, kind: input, shape index: {}]   ;;  %s859_s3 = inlined_call_operand.hbm [shape: bf16[2,128,128], index: 3, kind: input, shape index: {}]   ;;  %s860_s4 = inlined_call_operand.vmem [shape: f32[2,1,128], index: 4, kind: input, shape index: {}]   ;;  %s861_s5 = inlined_call_operand.hbm [shape: f32[8,128], index: 5, kind: output, shape index: {0}]   ;;  %s862_s6 = inlined_call_operand.hbm [shape: f32[8,128], index: 6, kind: output, shape index: {1}]  }
   0x1   :  { %13 = vsyncpa [#allocation6], 0 }
   0x2   :  { %14 = vsyncpa [#allocation9], 0 }
   0x3   :  { %15 = vsyncpa [#allocation4], 0  ;;  %s32_s23 = sshll.u32 %s857_s1, 4  ;;  %s33_s23 = int_to_ptr.hbm [resolvable:$true] %s32_s23 }
   0x4   :  { %16 = vsyncpa [#allocation12], 0  ;;  %s787_s24 = smov [#allocation5]   ;;  %s22_s28 = sshll.u32 %s856_s0, 4  ;;  %s23_s28 = int_to_ptr.hbm [resolvable:$true] %s22_s28 }
   0x5   :  { %s34_s25 = sshll.u32 %s787_s24, 4  ;;  %s788_s29 = smov 64   ;;  %s35_s25 = int_to_ptr.vmem [resolvable:$true] %s34_s25 }
   0x6   :  { %s789_s30 = smov 4   ;;  %s790_s7 = smov [#allocation2]  }
   0x7   :  { %40 = dma.hbm_to_vmem [thread:$0]  %s33_s23, 2048, %s35_s25, [#allocation6], %s788_s29, %s788_s29, %s789_s30  }
   0x8   :  { %s24_s8 = sshll.u32 %s790_s7, 4  ;;  %s45_s11 = sshll.u32 %s858_s2, 4  ;;  %s25_s8 = int_to_ptr.vmem [resolvable:$true] %s24_s8  ;;  %s46_s11 = int_to_ptr.hbm [resolvable:$true] %s45_s11 }
   0x9   :  { %27 = dma.hbm_to_vmem [thread:$0]  %s23_s28, 128, %s25_s8, [#allocation3]  }
   0xa   :  { %s791_s1 = smov [#allocation7]   ;;  %s58_s0 = sshll.u32 %s859_s3, 4  ;;  %s59_s0 = int_to_ptr.hbm [resolvable:$true] %s58_s0 }
   0xb   :  { %s47_s12 = sshll.u32 %s791_s1, 4  ;;  %s792_s15 = smov 16   ;;  %s48_s12 = int_to_ptr.vmem [resolvable:$true] %s47_s12 }
   0xc   :  { %s793_s16 = smov 1   ;;  %s794_s17 = smov [#allocation8]  }
   0xd   :  { %53 = dma.hbm_to_vmem [thread:$0]  %s46_s11, 32, %s48_s12, [#allocation6], %s792_s15, %s792_s15, %s793_s16  }
   0xe   :  { %s60_s18 = sshll.u32 %s794_s17, 4  ;;  %s61_s18 = int_to_ptr.vmem [resolvable:$true] %s60_s18 }
   0xf   :  { %66 = dma.hbm_to_vmem [thread:$0]  %s59_s0, 2048, %s61_s18, [#allocation9], %s788_s29, %s788_s29, %s789_s30  }
  0x10   :  { %777 = dma.done.wait [#allocation3], 128  }
  0x11   :  { %778 = vsyncadd [#allocation3], 4294967168 }
  0x12   :  { %779 = dma.done.wait [#allocation6], 2080  }
  0x13   :  { %780 = vsyncadd [#allocation6], 4294965216 }
  0x14   :  { %781 = dma.done.wait [#allocation9], 2048  }
  0x15   :  { %782 = vsyncadd [#allocation9], 4294965248  ;;  %v594_v0 = vld [vmem:[#allocation5 + $0x38] sm:$0xff]  ;;  %v593_v1 = vld [vmem:[#allocation5 + $0x30] sm:$0xff]  ;;  %s795_s19 = smov [#allocation11]   ;;  %s441_s23 = sshll.u32 %s862_s6, 4  ;;  %s442_s23 = int_to_ptr.hbm [resolvable:$true] %s441_s23 }
  0x16   :  { %155 = vmatpush.bf16.msra.mxu0 %v594_v0  ;;  %v602_v2 = vld [vmem:[#allocation5 + $0x78] sm:$0xff]  ;;  %v601_v3 = vld [vmem:[#allocation5 + $0x70] sm:$0xff]  ;;  %v592_v4 = vld [vmem:[#allocation5 + $0x28] sm:$0xff]  ;;  %s439_s20 = sshll.u32 %s795_s19, 4  ;;  %s796_s26 = smov [#allocation10]   ;;  %s440_s20 = int_to_ptr.vmem [resolvable:$true] %s439_s20 }
  0x17   :  { %240 = vmatpush.bf16.msra.mxu1 %v602_v2  ;;  %v600_v5 = vld [vmem:[#allocation5 + $0x68] sm:$0xff]  ;;  %v591_v6 = vld [vmem:[#allocation5 + $0x20] sm:$0xff]  ;;  %v590_v8 = vld [vmem:[#allocation5 + $0x18] sm:$0xff]  ;;  %s428_s27 = sshll.u32 %s796_s26, 4  ;;  %s430_s30 = sshll.u32 %s861_s5, 4  ;;  %s429_s27 = int_to_ptr.vmem [resolvable:$true] %s428_s27  ;;  %s431_s30 = int_to_ptr.hbm [resolvable:$true] %s430_s30 }
  0x18   :  { %v599_v7 = vld [vmem:[#allocation5 + $0x60] sm:$0xff]  ;;  %v598_v9 = vld [vmem:[#allocation5 + $0x58] sm:$0xff]  ;;  %v589_v10 = vld [vmem:[#allocation5 + $0x10] sm:$0xff] }
  0x19   :  { %v597_v11 = vld [vmem:[#allocation5 + $0x50] sm:$0xff]  ;;  %v588_v12 = vld [vmem:[#allocation5 + $0x8] sm:$0xff]  ;;  %v587_v13 = vld [vmem:[#allocation5] sm:$0xff] }
  0x1a   :  { %156 = vmatpush.bf16.msra.mxu0 %v593_v1  ;;  %v85_v14 = vld [vmem:[#allocation2] sm:$0xff]  ;;  %v596_v16 = vld [vmem:[#allocation5 + $0x48] sm:$0xff]  ;;  %v595_v17 = vld [vmem:[#allocation5 + $0x40] sm:$0xff] }
  0x1b   :  { %241 = vmatpush.bf16.msra.mxu1 %v601_v3  ;;  %v86_v15 = vpack.c.bf16 %v85_v14, %v85_v14  ;;  %v610_v18 = vld [vmem:[#allocation8 + $0x38] sm:$0xff]  ;;  %v609_v19 = vld [vmem:[#allocation8 + $0x30] sm:$0xff]  ;;  %v608_v20 = vld [vmem:[#allocation8 + $0x28] sm:$0xff] }
  0x1c   :  { %324 = vmatpush.bf16.msra.mxu2 %v610_v18  ;;  %v607_v21 = vld [vmem:[#allocation8 + $0x20] sm:$0xff]  ;;  %v606_v22 = vld [vmem:[#allocation8 + $0x18] sm:$0xff]  ;;  %v605_v23 = vld [vmem:[#allocation8 + $0x10] sm:$0xff] }
  0x1d   :  { %v629_v24 = vld [vmem:[#allocation7] ss:$0 sm:$0xff]  ;;  %v604_v30 = vld [vmem:[#allocation8 + $0x8] sm:$0xff]  ;;  %v603_v31 = vld [vmem:[#allocation8] sm:$0xff] }
  0x1e   :  { %157 = vmatpush.bf16.msra.mxu0 %v592_v4  ;;  %v618_v32 = vld [vmem:[#allocation8 + $0x78] sm:$0xff]  ;;  %v617_v33 = vld [vmem:[#allocation8 + $0x70] sm:$0xff]  ;;  %v616_v34 = vld [vmem:[#allocation8 + $0x68] sm:$0xff] }
  0x1f   :  { %242 = vmatpush.bf16.msra.mxu1 %v600_v5  ;;  %409 = vmatpush.bf16.msra.mxu3 %v618_v32  ;;  %v615_v35 = vld [vmem:[#allocation8 + $0x60] sm:$0xff]  ;;  %v614_v36 = vld [vmem:[#allocation8 + $0x58] sm:$0xff]  ;;  %v613_v37 = vld [vmem:[#allocation8 + $0x50] sm:$0xff] }
  0x20   :  { %325 = vmatpush.bf16.msra.mxu2 %v609_v19  ;;  %v630_v38 = vld [vmem:[#allocation7 + $0x1] ss:$0 sm:$0xff]  ;;  %v612_v44 = vld [vmem:[#allocation8 + $0x48] sm:$0xff]  ;;  %v611_v45 = vld [vmem:[#allocation8 + $0x40] sm:$0xff] }
  0x21   :  { %v631_v46 = vld [vmem:[%s860_s4] ss:$0 sm:$0xff]  ;;  %v632_v52 = vld [vmem:[%s860_s4 + $0x1] ss:$0 sm:$0xff] }
  0x22   :  { %158 = vmatpush.bf16.msra.mxu0 %v591_v6 }
  0x23   :  { %243 = vmatpush.bf16.msra.mxu1 %v599_v7  ;;  %410 = vmatpush.bf16.msra.mxu3 %v617_v33 }
  0x24   :  { %326 = vmatpush.bf16.msra.mxu2 %v608_v20 }
  0x26   :  { %159 = vmatpush.bf16.msra.mxu0 %v590_v8 }
  0x27   :  { %244 = vmatpush.bf16.msra.mxu1 %v598_v9  ;;  %411 = vmatpush.bf16.msra.mxu3 %v616_v34 }
  0x28   :  { %327 = vmatpush.bf16.msra.mxu2 %v607_v21 }
  0x2a   :  { %160 = vmatpush.bf16.msra.mxu0 %v589_v10 }
  0x2b   :  { %245 = vmatpush.bf16.msra.mxu1 %v597_v11  ;;  %412 = vmatpush.bf16.msra.mxu3 %v615_v35 }
  0x2c   :  { %328 = vmatpush.bf16.msra.mxu2 %v606_v22 }
  0x2e   :  { %161 = vmatpush.bf16.msra.mxu0 %v588_v12 }
  0x2f   :  { %246 = vmatpush.bf16.msra.mxu1 %v596_v16  ;;  %413 = vmatpush.bf16.msra.mxu3 %v614_v36 }
  0x30   :  { %329 = vmatpush.bf16.msra.mxu2 %v605_v23 }
  0x32   :  { %162 = vmatpush.bf16.msra.mxu0 %v587_v13 }
  0x33   :  { %247 = vmatpush.bf16.msra.mxu1 %v595_v17  ;;  %414 = vmatpush.bf16.msra.mxu3 %v613_v37 }
  0x34   :  { %330 = vmatpush.bf16.msra.mxu2 %v604_v30 }
  0x35   :  { %163 = vmatmul.bf16.vlgmr.msra.gmra.mxu0 %v86_v15 }
  0x37   :  { %415 = vmatpush.bf16.msra.mxu3 %v612_v44 }
  0x38   :  { %331 = vmatpush.bf16.msra.mxu2 %v603_v31 }
  0x3b   :  { %416 = vmatpush.bf16.msra.mxu3 %v611_v45 }
  0xb2   :  { %v164_v25 = vpop.f32.mrf.mxu0 }
  0xb3   :  { %v165_v26 = vadd.f32 %v629_v24, %v164_v25 }
  0xb5   :  { %v168_v27 = vmax.f32 %v165_v26, 0.0 }
  0xb7   :  { %v169_v28 = vpack.c.bf16 %v168_v27, %v168_v27 }
  0xb9   :  { %248 = vmatmul.bf16.vlgmr.msra.gmra.mxu1 %v169_v28 }
  0xba   :  { %v166_v29 = vpop.f32.mrf.mxu0 }
 0x136   :  { %v249_v39 = vpop.f32.mrf.mxu1 }
 0x137   :  { %v250_v40 = vadd.f32 %v630_v38, %v249_v39 }
 0x139   :  { %v253_v41 = vmax.f32 %v250_v40, 0.0 }
 0x13b   :  { %254 = vst [vmem:[#allocation11] sm:$0xff] %v253_v41  ;;  %v255_v42 = vpack.c.bf16 %v253_v41, %v253_v41 }
 0x13c   :  { %444 = dma.vmem_to_hbm [thread:$0]  %s440_s20, 128, %s442_s23, [#allocation12]  }
 0x13d   :  { %332 = vmatmul.bf16.vlgmr.msra.gmra.mxu2 %v255_v42 }
 0x13e   :  { %v251_v43 = vpop.f32.mrf.mxu1 }
 0x1c0   :  { %v333_v47 = vpop.f32.mrf.mxu2 }
 0x1c1   :  { %v334_v48 = vadd.f32 %v631_v46, %v333_v47 }
 0x1c3   :  { %v337_v49 = vmax.f32 %v334_v48, 0.0 }
 0x1c5   :  { %v338_v50 = vpack.c.bf16 %v337_v49, %v337_v49 }
 0x1c7   :  { %417 = vmatmul.bf16.vlgmr.msra.gmra.mxu3 %v338_v50 }
 0x1c8   :  { %v335_v51 = vpop.f32.mrf.mxu2 }
 0x24a   :  { %v418_v53 = vpop.f32.mrf.mxu3 }
 0x24b   :  { %v419_v54 = vadd.f32 %v632_v52, %v418_v53 }
 0x24d   :  { %422 = vst [vmem:[#allocation10] sm:$0xff] %v419_v54 }
 0x24e   :  { %433 = dma.vmem_to_hbm [thread:$0]  %s429_s27, 128, %s431_s30, [#allocation4]  }
 0x252   :  { %v420_v55 = vpop.f32.mrf.mxu3 }
 0x253   :  { %783 = dma.done.wait [#allocation4], 128  }
 0x254   :  { %784 = vsyncadd [#allocation4], 4294967168 }
 0x255   :  { %785 = dma.done.wait [#allocation12], 128  }
 0x256   :  { %786 = vsyncadd [#allocation12], 4294967168 }
 0x257   :  { %453 = vsyncpa [#allocation3], 1 }
 0x258   :  { %454 = vsyncpa [#allocation6], 1 }
 0x259   :  { %455 = vsyncpa [#allocation9], 1 }
 0x25a   :  { %456 = vsyncpa [#allocation4], 1 }
 0x25b   :  { %457 = vsyncpa [#allocation12], 1 }

</bundles_post_ra>
